<compile_context>
chip_gen: v7x
topology: tpu7x:2x2x1
jax: 0.10.0
libtpu: 0.0.40
codegen_flags: <defaults>
</compile_context>

<pallas_src>
import functools

import jax
import jax.numpy as jnp
from jax.experimental import pallas as pl
from jax.experimental.pallas import tpu as pltpu

SMOOTH = 1e-06
_LANE = 128


def _round_up(x, m):
    return (x + m - 1) // m * m


def _native_sublane(dtype):
    # Native packed-tile height: f32 -> 8 sublanes, bf16 -> 16, int8/fp8 -> 32.
    return max(8, 32 // jnp.dtype(dtype).itemsize)


def _vmem_capacity_bytes():
    try:
        info = pltpu.get_tpu_info()
        cap = int(getattr(info, "vmem_capacity_bytes", 0))
        if cap > 0:
            return cap
    except Exception:
        pass
    return 64 * 1024 * 1024  # conservative default: v7x per-TensorCore VMEM


def _partials_kernel(x_ref, t_ref, inter_ref, union_ref, sq_ref, *,
                     hw, block_hw, chunk, hw_blocks_per_seg, mask_hw, unroll):
    """Per-(n,c)-row partial sums, accumulated across the inner HW grid axis.

    Grid = (segment, row_block, hw_block).  Outputs are lane-dense
    (1, block_rows, chunk) f32 partial sums, VMEM-resident across the
    "arbitrary" hw axis and flushed to HBM once per (segment, row_block).
    """
    s = pl.program_id(0)
    j = pl.program_id(2)

    @pl.when(j == 0)
    def _():
        inter_ref[...] = jnp.zeros_like(inter_ref)
        union_ref[...] = jnp.zeros_like(union_ref)
        sq_ref[...] = jnp.zeros_like(sq_ref)

    rows = x_ref.shape[0]
    num_chunks = block_hw // chunk
    # Global lane offset of this block inside the flattened H*W axis.
    hw_base = (s * hw_blocks_per_seg + j) * block_hw

    def body(k, carry):
        inter_c, union_c, sq_c = carry
        start = pl.multiple_of(k * chunk, chunk)
        x = x_ref[:, pl.ds(start, chunk)].astype(jnp.float32)
        t = t_ref[:, pl.ds(start, chunk)].astype(jnp.float32)
        if mask_hw:
            # Zero out-of-range lanes BEFORE the multiplies (0*NaN = NaN).
            col = hw_base + start + jax.lax.broadcasted_iota(
                jnp.int32, (rows, chunk), 1)
            keep = col < hw
            x = jnp.where(keep, x, 0.0)
            t = jnp.where(keep, t, 0.0)
        d = x - t
        return (inter_c + x * t, union_c + (x + t), sq_c + d * d)

    zeros = jnp.zeros((rows, chunk), jnp.float32)
    inter_c, union_c, sq_c = jax.lax.fori_loop(
        0, num_chunks, body, (zeros, zeros, zeros), unroll=unroll)

    # Touch the VMEM-resident output accumulators once per grid step.
    inter_ref[0] += inter_c
    union_ref[0] += union_c
    sq_ref[0] += sq_c


@functools.partial(jax.jit, static_argnames=("smooth",))
def dice_mse_pallas(inputs, targets, smooth=SMOOTH):
    """inputs, targets: (N, C, H, W) arrays (any float dtype). Returns scalar f32."""
    N, C, H, W = inputs.shape
    NC, HW = N * C, H * W

    # Flatten to (N*C, H*W): H*W -> lanes, (n, c) rows -> sublanes.  Free reshape.
    x = inputs.reshape(NC, HW)
    t = targets.reshape(NC, HW)
    isx = jnp.dtype(x.dtype).itemsize
    ist = jnp.dtype(t.dtype).itemsize

    # Rows per block: dtype-aware sublane rounding, capped so the vreg-carried
    # chunk accumulators stay small.
    sub = max(_native_sublane(x.dtype), _native_sublane(t.dtype))
    block_rows = _round_up(min(NC, 64), sub)
    row_blocks = pl.cdiv(NC, block_rows)

    # Lane chunk per inner-loop step; 3 f32 carries of (block_rows, chunk)
    # stay <= ~12 vregs.
    chunk = max(_LANE, min(512, (4096 // block_rows) // _LANE * _LANE))
    hw_cap = _round_up(HW, chunk)

    # VMEM budgets derived from the queried capacity: one (x, t) block pair,
    # double-buffered, stays under ~half of physical VMEM on every generation.
    cap = _vmem_capacity_bytes()
    pair_budget = max(1 << 20, min(32 << 20, cap // 4))
    budget_hw = max(chunk,
                    (pair_budget // (block_rows * (isx + ist))) // chunk * chunk)

    m_cap = hw_cap // chunk
    if row_blocks >= 2 or m_cap < 2 or m_cap % 2 != 0:
        # Rows already give >= 2 parallel blocks, or HW can't be split evenly
        # into two chunk-aligned halves: single segment; ragged last HW block
        # is handled by the in-kernel lane mask.
        nseg = 1
        block_hw = min(budget_hw, hw_cap)
        per_seg = pl.cdiv(HW, block_hw)
    else:
        # Row axis has a single block: split HW into 2 parallel segments so
        # v7x megacore can shard the streaming reduction across both cores.
        nseg = 2
        seg_lanes = hw_cap // 2
        m_seg = seg_lanes // chunk
        per_seg = pl.cdiv(seg_lanes, min(budget_hw, seg_lanes))
        while m_seg % per_seg != 0:   # block_hw must evenly tile each segment
            per_seg += 1
        block_hw = seg_lanes // per_seg

    mask_hw = (HW % block_hw) != 0
    num_chunks = block_hw // chunk
    unroll = max(1, min(8, num_chunks))

    grid = (nseg, row_blocks, per_seg)

    in_spec = pl.BlockSpec((block_rows, block_hw),
                           lambda s, i, j: (i, s * per_seg + j))
    out_spec = pl.BlockSpec((1, block_rows, chunk), lambda s, i, j: (s, i, 0))
    out_sds = jax.ShapeDtypeStruct((nseg, NC, chunk), jnp.float32)

    pair_bytes = block_rows * block_hw * (isx + ist)
    out_bytes = 3 * 2 * block_rows * chunk * 4
    vmem_limit = max(2 * pair_bytes + out_bytes + (8 << 20), 16 << 20)
    vmem_limit = min(vmem_limit, cap * 3 // 4)

    kernel = functools.partial(
        _partials_kernel, hw=HW, block_hw=block_hw, chunk=chunk,
        hw_blocks_per_seg=per_seg, mask_hw=mask_hw, unroll=unroll)

    inter, union, sq = pl.pallas_call(
        kernel,
        out_shape=(out_sds, out_sds, out_sds),
        grid_spec=pltpu.PrefetchScalarGridSpec(
            num_scalar_prefetch=0,
            grid=grid,
            in_specs=[in_spec, in_spec],
            out_specs=(out_spec, out_spec, out_spec),
        ),
        compiler_params=pltpu.CompilerParams(
            dimension_semantics=("parallel", "parallel", "arbitrary"),
            vmem_limit_bytes=int(vmem_limit),
        ),
    )(x, t)

    # Tiny epilogue in plain JAX / f32: segment + lane reduction, dice & mse.
    inter = jnp.sum(inter, axis=(0, 2))          # (N*C,)
    union = jnp.sum(union, axis=(0, 2))          # (N*C,)
    sq_total = jnp.sum(sq)
    dice_score = (2.0 * inter + smooth) / (union + smooth)
    dice_loss = 1.0 - jnp.mean(dice_score)
    mse = sq_total / (NC * HW)
    return dice_loss + mse


def dice_mse_ref(inputs, targets, smooth=SMOOTH):
    x = inputs.astype(jnp.float32)
    t = targets.astype(jnp.float32)
    inter = jnp.sum(x * t, axis=(2, 3))
    union = jnp.sum(x + t, axis=(2, 3))
    dice_score = (2.0 * inter + smooth) / (union + smooth)
    dice_loss = 1.0 - jnp.mean(dice_score)
    mse = jnp.mean((x - t) ** 2)
    return dice_loss + mse


if __name__ == "__main__":
    key = jax.random.PRNGKey(0)
    k1, k2, k3, k4 = jax.random.split(key, 4)

    # Primary test: f32, shapes implied by the module (N, C, H, W).
    N, C, H, W = 2, 4, 16, 16
    inputs = jax.nn.sigmoid(jax.random.normal(k1, (N, C, H, W), dtype=jnp.float32))
    targets = (jax.random.uniform(k2, (N, C, H, W)) > 0.5).astype(jnp.float32)

    out = jax.block_until_ready(dice_mse_pallas(inputs, targets))
    ref = jax.block_until_ready(dice_mse_ref(inputs, targets))
    assert jnp.allclose(out, ref, rtol=1e-5, atol=1e-5), (out, ref)

    # Secondary test: bf16 inputs + misaligned shape (NC=6, HW=784) exercising
    # the in-kernel lane mask, the partial row block and the 2-segment split.
    N2, C2, H2, W2 = 2, 3, 28, 28
    inputs2 = jax.nn.sigmoid(
        jax.random.normal(k3, (N2, C2, H2, W2), dtype=jnp.float32)
    ).astype(jnp.bfloat16)
    targets2 = (jax.random.uniform(k4, (N2, C2, H2, W2)) > 0.5).astype(jnp.bfloat16)

    out2 = jax.block_until_ready(dice_mse_pallas(inputs2, targets2))
    ref2 = jax.block_until_ready(dice_mse_ref(inputs2, targets2))
    assert jnp.allclose(out2, ref2, rtol=1e-5, atol=1e-5), (out2, ref2)

    print("KERNEL_OK")
</pallas_src>

<mosaic_0001>
module attributes {stable_mosaic.version = 11 : i64} {
  func.func @_partials_kernel(%arg0: i32, %arg1: i32, %arg2: i32, %arg3: memref<8x512xf32, #tpu.memory_space<vmem>>, %arg4: memref<8x512xf32, #tpu.memory_space<vmem>>, %arg5: memref<1x8x512xf32, #tpu.memory_space<vmem>>, %arg6: memref<1x8x512xf32, #tpu.memory_space<vmem>>, %arg7: memref<1x8x512xf32, #tpu.memory_space<vmem>>) attributes {dimension_semantics = [#tpu.dimension_semantics<parallel>, #tpu.dimension_semantics<parallel>, #tpu.dimension_semantics<arbitrary>], iteration_bounds = array<i64: 1, 1, 1>, scalar_prefetch = 0 : i64, scratch_operands = 0 : i64, tpu.core_type = #tpu.core_type<tc>, window_params = [{transform_indices = @transform_0, window_bounds = array<i64: 8, 512>}, {transform_indices = @transform_1, window_bounds = array<i64: 8, 512>}, {transform_indices = @transform_2, window_bounds = array<i64: 1, 8, 512>}, {transform_indices = @transform_3, window_bounds = array<i64: 1, 8, 512>}, {transform_indices = @transform_4, window_bounds = array<i64: 1, 8, 512>}]} {
    %c0_i32 = arith.constant 0 : i32
    %0 = arith.cmpi eq, %arg2, %c0_i32 : i32
    %1 = arith.extui %0 : i1 to i32
    %c0_i32_0 = arith.constant 0 : i32
    %2 = arith.cmpi ne, %1, %c0_i32_0 : i32
    scf.if %2 {
      %cst_25 = arith.constant 0.000000e+00 : f32
      %48 = vector.broadcast %cst_25 : f32 to vector<1x8x512xf32>
      %c0_26 = arith.constant 0 : index
      %c0_27 = arith.constant 0 : index
      %c0_28 = arith.constant 0 : index
      %49 = vector.load %arg5[%c0_26, %c0_27, %c0_28] : memref<1x8x512xf32, #tpu.memory_space<vmem>>, vector<1x8x512xf32>
      tpu.vector_store %arg5[%c0_26, %c0_27, %c0_28], %48 {strides = array<i32>} : memref<1x8x512xf32, #tpu.memory_space<vmem>>, vector<1x8x512xf32>,
      %cst_29 = arith.constant 0.000000e+00 : f32
      %50 = vector.broadcast %cst_29 : f32 to vector<1x8x512xf32>
      %c0_30 = arith.constant 0 : index
      %c0_31 = arith.constant 0 : index
      %c0_32 = arith.constant 0 : index
      %51 = vector.load %arg6[%c0_30, %c0_31, %c0_32] : memref<1x8x512xf32, #tpu.memory_space<vmem>>, vector<1x8x512xf32>
      tpu.vector_store %arg6[%c0_30, %c0_31, %c0_32], %50 {strides = array<i32>} : memref<1x8x512xf32, #tpu.memory_space<vmem>>, vector<1x8x512xf32>,
      %cst_33 = arith.constant 0.000000e+00 : f32
      %52 = vector.broadcast %cst_33 : f32 to vector<1x8x512xf32>
      %c0_34 = arith.constant 0 : index
      %c0_35 = arith.constant 0 : index
      %c0_36 = arith.constant 0 : index
      %53 = vector.load %arg7[%c0_34, %c0_35, %c0_36] : memref<1x8x512xf32, #tpu.memory_space<vmem>>, vector<1x8x512xf32>
      tpu.vector_store %arg7[%c0_34, %c0_35, %c0_36], %52 {strides = array<i32>} : memref<1x8x512xf32, #tpu.memory_space<vmem>>, vector<1x8x512xf32>,
    } else {
    }
    %c1_i32 = arith.constant 1 : i32
    %3 = arith.muli %arg0, %c1_i32 : i32
    %4 = arith.addi %3, %arg2 : i32
    %c512_i32 = arith.constant 512 : i32
    %5 = arith.muli %4, %c512_i32 : i32
    %cst = arith.constant 0.000000e+00 : f32
    %6 = vector.broadcast %cst : f32 to vector<8x512xf32>
    %c0_i32_1 = arith.constant 0 : i32
    %c512_i32_2 = arith.constant 512 : i32
    %7 = arith.muli %c0_i32_1, %c512_i32_2 : i32
    %8 = tpu.assume_multiple %7, 512 : i32
    %c0 = arith.constant 0 : index
    %9 = arith.index_cast %8 : i32 to index
    %10 = vector.load %arg3[%c0, %9] : memref<8x512xf32, #tpu.memory_space<vmem>>, vector<8x512xf32>
    %c0_3 = arith.constant 0 : index
    %11 = arith.index_cast %8 : i32 to index
    %12 = vector.load %arg4[%c0_3, %11] : memref<8x512xf32, #tpu.memory_space<vmem>>, vector<8x512xf32>
    %13 = arith.addi %5, %8 : i32
    %14 = tpu.iota {dimensions = array<i32: 1>} : vector<8x512xi32>
    %15 = vector.broadcast %13 : i32 to vector<8x512xi32>
    %16 = arith.addi %15, %14 : vector<8x512xi32>
    %c256_i32 = arith.constant 256 : i32
    %17 = vector.broadcast %c256_i32 : i32 to vector<8x512xi32>
    %18 = arith.cmpi slt, %16, %17 : vector<8x512xi32>
    %cst_4 = arith.constant 0.000000e+00 : f32
    %19 = vector.broadcast %cst_4 : f32 to vector<8x512xf32>
    %20 = arith.select %18, %10, %19 : vector<8x512xi1>, vector<8x512xf32>
    %cst_5 = arith.constant 0.000000e+00 : f32
    %21 = vector.broadcast %cst_5 : f32 to vector<8x512xf32>
    %22 = arith.select %18, %12, %21 : vector<8x512xi1>, vector<8x512xf32>
    %23 = arith.subf %20, %22 : vector<8x512xf32>
    %24 = arith.mulf %20, %22 : vector<8x512xf32>
    %25 = arith.addf %6, %24 : vector<8x512xf32>
    %26 = arith.addf %20, %22 : vector<8x512xf32>
    %27 = arith.addf %6, %26 : vector<8x512xf32>
    %28 = arith.mulf %23, %23 : vector<8x512xf32>
    %29 = arith.addf %6, %28 : vector<8x512xf32>
    %c1_i32_6 = arith.constant 1 : i32
    %c0_7 = arith.constant 0 : index
    %c0_8 = arith.constant 0 : index
    %c0_9 = arith.constant 0 : index
    %30 = vector.load %arg5[%c0_7, %c0_8, %c0_9] : memref<1x8x512xf32, #tpu.memory_space<vmem>>, vector<1x8x512xf32>
    %31 = vector.shape_cast %30 : vector<1x8x512xf32> to vector<8x512xf32>
    %32 = arith.addf %31, %25 : vector<8x512xf32>
    %c0_10 = arith.constant 0 : index
    %c0_11 = arith.constant 0 : index
    %c0_12 = arith.constant 0 : index
    %33 = vector.load %arg5[%c0_10, %c0_11, %c0_12] : memref<1x8x512xf32, #tpu.memory_space<vmem>>, vector<1x8x512xf32>
    %34 = vector.shape_cast %33 : vector<1x8x512xf32> to vector<8x512xf32>
    %35 = vector.shape_cast %32 : vector<8x512xf32> to vector<1x8x512xf32>
    tpu.vector_store %arg5[%c0_10, %c0_11, %c0_12], %35 {strides = array<i32>} : memref<1x8x512xf32, #tpu.memory_space<vmem>>, vector<1x8x512xf32>,
    %c0_13 = arith.constant 0 : index
    %c0_14 = arith.constant 0 : index
    %c0_15 = arith.constant 0 : index
    %36 = vector.load %arg6[%c0_13, %c0_14, %c0_15] : memref<1x8x512xf32, #tpu.memory_space<vmem>>, vector<1x8x512xf32>
    %37 = vector.shape_cast %36 : vector<1x8x512xf32> to vector<8x512xf32>
    %38 = arith.addf %37, %27 : vector<8x512xf32>
    %c0_16 = arith.constant 0 : index
    %c0_17 = arith.constant 0 : index
    %c0_18 = arith.constant 0 : index
    %39 = vector.load %arg6[%c0_16, %c0_17, %c0_18] : memref<1x8x512xf32, #tpu.memory_space<vmem>>, vector<1x8x512xf32>
    %40 = vector.shape_cast %39 : vector<1x8x512xf32> to vector<8x512xf32>
    %41 = vector.shape_cast %38 : vector<8x512xf32> to vector<1x8x512xf32>
    tpu.vector_store %arg6[%c0_16, %c0_17, %c0_18], %41 {strides = array<i32>} : memref<1x8x512xf32, #tpu.memory_space<vmem>>, vector<1x8x512xf32>,
    %c0_19 = arith.constant 0 : index
    %c0_20 = arith.constant 0 : index
    %c0_21 = arith.constant 0 : index
    %42 = vector.load %arg7[%c0_19, %c0_20, %c0_21] : memref<1x8x512xf32, #tpu.memory_space<vmem>>, vector<1x8x512xf32>
    %43 = vector.shape_cast %42 : vector<1x8x512xf32> to vector<8x512xf32>
    %44 = arith.addf %43, %29 : vector<8x512xf32>
    %c0_22 = arith.constant 0 : index
    %c0_23 = arith.constant 0 : index
    %c0_24 = arith.constant 0 : index
    %45 = vector.load %arg7[%c0_22, %c0_23, %c0_24] : memref<1x8x512xf32, #tpu.memory_space<vmem>>, vector<1x8x512xf32>
    %46 = vector.shape_cast %45 : vector<1x8x512xf32> to vector<8x512xf32>
    %47 = vector.shape_cast %44 : vector<8x512xf32> to vector<1x8x512xf32>
    tpu.vector_store %arg7[%c0_22, %c0_23, %c0_24], %47 {strides = array<i32>} : memref<1x8x512xf32, #tpu.memory_space<vmem>>, vector<1x8x512xf32>,
    return
  }
  func.func @transform_0(%arg0: i32, %arg1: i32, %arg2: i32) -> (i32, i32) {
    %c1_i32 = arith.constant 1 : i32
    %0 = arith.muli %arg0, %c1_i32 : i32
    %1 = arith.addi %0, %arg2 : i32
    %c0_i32 = arith.constant 0 : i32
    return %arg1, %1 : i32, i32
  }
  func.func @transform_1(%arg0: i32, %arg1: i32, %arg2: i32) -> (i32, i32) {
    %c1_i32 = arith.constant 1 : i32
    %0 = arith.muli %arg0, %c1_i32 : i32
    %1 = arith.addi %0, %arg2 : i32
    %c0_i32 = arith.constant 0 : i32
    return %arg1, %1 : i32, i32
  }
  func.func @transform_2(%arg0: i32, %arg1: i32, %arg2: i32) -> (i32, i32, i32) {
    %c0_i32 = arith.constant 0 : i32
    %c0_i32_0 = arith.constant 0 : i32
    return %arg0, %arg1, %c0_i32 : i32, i32, i32
  }
  func.func @transform_3(%arg0: i32, %arg1: i32, %arg2: i32) -> (i32, i32, i32) {
    %c0_i32 = arith.constant 0 : i32
    %c0_i32_0 = arith.constant 0 : i32
    return %arg0, %arg1, %c0_i32 : i32, i32, i32
  }
  func.func @transform_4(%arg0: i32, %arg1: i32, %arg2: i32) -> (i32, i32, i32) {
    %c0_i32 = arith.constant 0 : i32
    %c0_i32_0 = arith.constant 0 : i32
    return %arg0, %arg1, %c0_i32 : i32, i32, i32
  }
}

</mosaic_0001>

<bundles_post_ra>
// kernel: dice_mse_pallas.1
= control target key start
LH: loop header
LB: loop body
LE: loop exit
PB: predicated region body
PF: predicated region fallthrough
CT: control target
= control target key end

     0   :  { %v216_v3 = vmov 0.0   ;;  %s290_s2 = inlined_call_operand.vmem [shape: f32[1,8,512], index: 2, kind: output, shape index: {0}]   ;;  %s291_s3 = inlined_call_operand.vmem [shape: f32[1,8,512], index: 3, kind: output, shape index: {1}]   ;;  %s292_s4 = inlined_call_operand.vmem [shape: f32[1,8,512], index: 4, kind: output, shape index: {2}]   ;;  %s293_s0 = inlined_call_operand.vmem [shape: f32[8,256], index: 0, kind: input, shape index: {}]   ;;  %s294_s1 = inlined_call_operand.vmem [shape: f32[8,256], index: 1, kind: input, shape index: {}]  }
   0x1   :  { %v96_v0 = vld [vmem:[%s293_s0] sm:$0xff]  ;;  %v97_v2 = vld [vmem:[%s293_s0 + $0x8] sm:$0xff]  ;;  %165 = vst [vmem:[%s290_s2 + $0x10] sm:$0xff] %v216_v3  ;;  %166 = vst [vmem:[%s290_s2 + $0x18] sm:$0xff] %v216_v3 }
   0x2   :  { %v100_v1 = vld [vmem:[%s294_s1] sm:$0xff]  ;;  %177 = vst [vmem:[%s291_s3 + $0x10] sm:$0xff] %v216_v3  ;;  %178 = vst [vmem:[%s291_s3 + $0x18] sm:$0xff] %v216_v3  ;;  %v101_v5 = vld [vmem:[%s294_s1 + $0x8] sm:$0xff] }
   0x3   :  { %189 = vst [vmem:[%s292_s4 + $0x10] sm:$0xff] %v216_v3  ;;  %190 = vst [vmem:[%s292_s4 + $0x18] sm:$0xff] %v216_v3  ;;  %v131_v4 = vmul.f32 %v100_v1, %v96_v0  ;;  %v139_v6 = vadd.f32 %v100_v1, %v96_v0  ;;  %v127_v7 = vsub.f32 %v96_v0, %v100_v1 }
   0x4   :  { %v132_v8 = vmul.f32 %v101_v5, %v97_v2  ;;  %v140_v9 = vadd.f32 %v101_v5, %v97_v2  ;;  %v128_v10 = vsub.f32 %v97_v2, %v101_v5 }
   0x5   :  { %v147_v11 = vmul.f32 %v127_v7, %v127_v7  ;;  %163 = vst [vmem:[%s290_s2] sm:$0xff] %v131_v4  ;;  %175 = vst [vmem:[%s291_s3] sm:$0xff] %v139_v6 }
   0x6   :  { %v148_v12 = vmul.f32 %v128_v10, %v128_v10  ;;  %164 = vst [vmem:[%s290_s2 + $0x8] sm:$0xff] %v132_v8  ;;  %176 = vst [vmem:[%s291_s3 + $0x8] sm:$0xff] %v140_v9 }
   0x7   :  { %187 = vst [vmem:[%s292_s4] sm:$0xff] %v147_v11 }
   0x8   :  { %188 = vst [vmem:[%s292_s4 + $0x8] sm:$0xff] %v148_v12 }

</bundles_post_ra>
